<compile_context>
chip_gen: v5e
topology: v5e:2x2
jax: 0.10.0
libtpu: 0.0.40
codegen_flags: <defaults>
</compile_context>

<pallas_src>
import functools

import jax
import jax.numpy as jnp
from jax import lax
from jax.experimental import pallas as pl
from jax.experimental.pallas import tpu as pltpu

LANE = 128  # TPU lane width: hidden and action dims are padded to this for lane-dense tiles


def ppo_actor_sample_kernel(x_ref, w1_ref, b1_ref, w2_ref, b2_ref, w3_ref, b3_ref,
                            u_ref, probs_ref, act_ref, *, n_actions):
    """Fused actor MLP + softmax + categorical (inverse-CDF) sampling, all in VMEM.

    Shapes (padded lane-dense by the wrapper):
      x:  (B, S)
      w1: (S, Hp)   b1: (1, Hp)
      w2: (Hp, Hp)  b2: (1, Hp)
      w3: (Hp, Ap)  b3: (1, Ap)
      u:  (B, 1)    uniform draws in [0, 1)
      probs: (B, Ap) f32   (first n_actions lanes are the real probabilities)
      act:   (B, Ap) i32   (sampled action index, broadcast across lanes)
    """
    x = x_ref[...]
    h1 = jnp.maximum(
        jnp.dot(x, w1_ref[...], preferred_element_type=jnp.float32) + b1_ref[...], 0.0)
    h2 = jnp.maximum(
        jnp.dot(h1, w2_ref[...], preferred_element_type=jnp.float32) + b2_ref[...], 0.0)
    logits = jnp.dot(h2, w3_ref[...], preferred_element_type=jnp.float32) + b3_ref[...]

    B, Ap = probs_ref.shape
    # mask padded action lanes so they carry zero probability mass
    lane = lax.broadcasted_iota(jnp.int32, (B, Ap), 1)
    logits = jnp.where(lane < n_actions, logits, -1e30)

    # numerically-stable softmax; approx reciprocal runs on the otherwise-idle EUP
    m = jnp.max(logits, axis=-1, keepdims=True)
    e = jnp.exp(logits - m)
    denom = jnp.sum(e, axis=-1, keepdims=True)
    probs = e * pl.reciprocal(denom, approx=True)
    probs_ref[...] = probs

    # Inverse-CDF categorical sample, fused in-kernel.
    # cdf[b, j] = sum_{k <= j} probs[b, k], computed as a lower-triangular-ones matmul
    # on the MXU (avoids any cross-lane scan on the VPU/XLU).
    row = lax.broadcasted_iota(jnp.int32, (Ap, Ap), 0)
    col = lax.broadcasted_iota(jnp.int32, (Ap, Ap), 1)
    lower_tri = (row <= col).astype(jnp.float32)
    cdf = jnp.dot(probs, lower_tri, preferred_element_type=jnp.float32)

    u = u_ref[...]                                                     # (B, 1)
    counts = jnp.sum((cdf < u).astype(jnp.float32), axis=-1, keepdims=True)
    # clamp: fp rounding can leave cdf[A-1] slightly below u when u ~ 1
    action = jnp.minimum(counts.astype(jnp.int32), n_actions - 1)      # (B, 1)
    act_ref[...] = action + jnp.zeros((B, Ap), jnp.int32)              # lane-dense store


def _pallas_actor_sample(x, padded_params, u, n_actions):
    """Run the fused kernel. Returns (probs (B, A), actions (B,) int32)."""
    w1, b1, w2, b2, w3, b3 = padded_params
    B = x.shape[0]
    Ap = w3.shape[1]
    vmem = pl.BlockSpec(memory_space=pltpu.MemorySpace.VMEM)
    kernel = functools.partial(ppo_actor_sample_kernel, n_actions=n_actions)
    probs_p, act_p = pl.pallas_call(
        kernel,
        out_shape=(jax.ShapeDtypeStruct((B, Ap), jnp.float32),
                   jax.ShapeDtypeStruct((B, Ap), jnp.int32)),
        in_specs=[vmem] * 8,
        out_specs=(vmem, vmem),
    )(x, w1, b1, w2, b2, w3, b3, u)
    return probs_p[:, :n_actions], act_p[:, 0]


@functools.partial(jax.jit, static_argnames=("n_actions",))
def actor_sample(x, padded_params, key, *, n_actions):
    """Batched: actor probabilities + a sampled action per row."""
    u = jax.random.uniform(key, (x.shape[0], 1), dtype=jnp.float32)
    return _pallas_actor_sample(x, padded_params, u, n_actions)


def ppo_forward(x_single, padded_params, key, n_actions):
    """PPO.forward: single observation -> sampled action (int), mirrors action.item()."""
    x = jnp.asarray(x_single, jnp.float32).reshape(1, -1)
    probs, actions = actor_sample(x, padded_params, key, n_actions=n_actions)
    return int(actions[0]), probs[0]


def init_params(key, S, H, A):
    ks = jax.random.split(key, 3)
    scale = 0.1
    w1 = scale * jax.random.normal(ks[0], (S, H), jnp.float32)
    b1 = jnp.zeros((1, H), jnp.float32)
    w2 = scale * jax.random.normal(ks[1], (H, H), jnp.float32)
    b2 = jnp.zeros((1, H), jnp.float32)
    w3 = scale * jax.random.normal(ks[2], (H, A), jnp.float32)
    b3 = jnp.zeros((1, A), jnp.float32)
    return (w1, b1, w2, b2, w3, b3)


def pad_params(params, hp=LANE, ap=LANE):
    """Zero-pad hidden/action dims to full 128-lane tiles (done once, off the hot path)."""
    w1, b1, w2, b2, w3, b3 = params
    S, H = w1.shape
    A = w3.shape[1]
    w1p = jnp.zeros((S, hp), jnp.float32).at[:, :H].set(w1)
    b1p = jnp.zeros((1, hp), jnp.float32).at[:, :H].set(b1)
    w2p = jnp.zeros((hp, hp), jnp.float32).at[:H, :H].set(w2)
    b2p = jnp.zeros((1, hp), jnp.float32).at[:, :H].set(b2)
    w3p = jnp.zeros((hp, ap), jnp.float32).at[:H, :A].set(w3)
    b3p = jnp.zeros((1, ap), jnp.float32).at[:, :A].set(b3)
    return (w1p, b1p, w2p, b2p, w3p, b3p)


if __name__ == "__main__":
    S, H, A = 16, 32, 8          # state dim, hidden, n actions
    B = 8                        # small batch of observations (per-row sampling)
    root = jax.random.PRNGKey(0)
    k_param, k_x, k_batch, k_single = jax.random.split(root, 4)

    params = init_params(k_param, S, H, A)
    padded = pad_params(params)
    x = jax.random.normal(k_x, (B, S), jnp.float32)

    probs, actions = actor_sample(x, padded, k_batch, n_actions=A)
    probs = jax.block_until_ready(probs)
    actions = jax.block_until_ready(actions)

    # sanity: shapes, valid probabilities (approx reciprocal -> ~1e-3 normalization),
    # actions in range, and agreement with a plain-JAX reference actor
    assert probs.shape == (B, A)
    assert actions.shape == (B,)
    assert bool(jnp.all(probs >= 0.0))
    assert bool(jnp.allclose(jnp.sum(probs, axis=-1), 1.0, atol=5e-3))
    assert bool(jnp.all((actions >= 0) & (actions < A)))

    w1, b1, w2, b2, w3, b3 = params
    h1 = jnp.maximum(x @ w1 + b1, 0.0)
    h2 = jnp.maximum(h1 @ w2 + b2, 0.0)
    ref_probs = jax.nn.softmax(h2 @ w3 + b3, axis=-1)
    assert bool(jnp.allclose(probs, ref_probs, atol=5e-3))

    # single-observation path, mirroring PPO.forward(x) -> action.item()
    action0, probs0 = ppo_forward(x[0], padded, k_single, A)
    assert 0 <= action0 < A
    assert probs0.shape == (A,)

    print("KERNEL_OK")
</pallas_src>

<mosaic_0001>
module attributes {stable_mosaic.version = 11 : i64} {
  func.func @ppo_actor_sample_kernel(%arg0: memref<8x16xf32, #tpu.memory_space<vmem>>, %arg1: memref<16x128xf32, #tpu.memory_space<vmem>>, %arg2: memref<1x128xf32, #tpu.memory_space<vmem>>, %arg3: memref<128x128xf32, #tpu.memory_space<vmem>>, %arg4: memref<1x128xf32, #tpu.memory_space<vmem>>, %arg5: memref<128x128xf32, #tpu.memory_space<vmem>>, %arg6: memref<1x128xf32, #tpu.memory_space<vmem>>, %arg7: memref<8x1xf32, #tpu.memory_space<vmem>>, %arg8: memref<8x128xf32, #tpu.memory_space<vmem>>, %arg9: memref<8x128xi32, #tpu.memory_space<vmem>>) attributes {dimension_semantics = [], scalar_prefetch = 0 : i64, scratch_operands = 0 : i64, tpu.core_type = #tpu.core_type<tc>} {
    %c0 = arith.constant 0 : index
    %c0_0 = arith.constant 0 : index
    %0 = vector.load %arg0[%c0, %c0_0] : memref<8x16xf32, #tpu.memory_space<vmem>>, vector<8x16xf32>
    %c0_1 = arith.constant 0 : index
    %c0_2 = arith.constant 0 : index
    %1 = vector.load %arg1[%c0_1, %c0_2] : memref<16x128xf32, #tpu.memory_space<vmem>>, vector<16x128xf32>
    %cst = arith.constant dense<0.000000e+00> : vector<8x128xf32>
    %2 = tpu.matmul %0, %1, %cst {dimension_numbers = #tpu.dot_dimension_numbers<[1], [0], [0], [1], [0, 0, 1, 1], [], []>} : vector<8x16xf32>, vector<16x128xf32>, vector<8x128xf32> -> vector<8x128xf32>
    %c0_3 = arith.constant 0 : index
    %c0_4 = arith.constant 0 : index
    %3 = vector.load %arg2[%c0_3, %c0_4] : memref<1x128xf32, #tpu.memory_space<vmem>>, vector<1x128xf32>
    %4 = vector.broadcast %3 : vector<1x128xf32> to vector<8x128xf32>
    %5 = arith.addf %2, %4 : vector<8x128xf32>
    %cst_5 = arith.constant 0.000000e+00 : f32
    %6 = vector.broadcast %cst_5 : f32 to vector<8x128xf32>
    %7 = arith.maximumf %5, %6 : vector<8x128xf32>
    %c0_6 = arith.constant 0 : index
    %c0_7 = arith.constant 0 : index
    %8 = vector.load %arg3[%c0_6, %c0_7] : memref<128x128xf32, #tpu.memory_space<vmem>>, vector<128x128xf32>
    %cst_8 = arith.constant dense<0.000000e+00> : vector<8x128xf32>
    %9 = tpu.matmul %7, %8, %cst_8 {dimension_numbers = #tpu.dot_dimension_numbers<[1], [0], [0], [1], [0, 0, 1, 1], [], []>} : vector<8x128xf32>, vector<128x128xf32>, vector<8x128xf32> -> vector<8x128xf32>
    %c0_9 = arith.constant 0 : index
    %c0_10 = arith.constant 0 : index
    %10 = vector.load %arg4[%c0_9, %c0_10] : memref<1x128xf32, #tpu.memory_space<vmem>>, vector<1x128xf32>
    %11 = vector.broadcast %10 : vector<1x128xf32> to vector<8x128xf32>
    %12 = arith.addf %9, %11 : vector<8x128xf32>
    %cst_11 = arith.constant 0.000000e+00 : f32
    %13 = vector.broadcast %cst_11 : f32 to vector<8x128xf32>
    %14 = arith.maximumf %12, %13 : vector<8x128xf32>
    %c0_12 = arith.constant 0 : index
    %c0_13 = arith.constant 0 : index
    %15 = vector.load %arg5[%c0_12, %c0_13] : memref<128x128xf32, #tpu.memory_space<vmem>>, vector<128x128xf32>
    %cst_14 = arith.constant dense<0.000000e+00> : vector<8x128xf32>
    %16 = tpu.matmul %14, %15, %cst_14 {dimension_numbers = #tpu.dot_dimension_numbers<[1], [0], [0], [1], [0, 0, 1, 1], [], []>} : vector<8x128xf32>, vector<128x128xf32>, vector<8x128xf32> -> vector<8x128xf32>
    %c0_15 = arith.constant 0 : index
    %c0_16 = arith.constant 0 : index
    %17 = vector.load %arg6[%c0_15, %c0_16] : memref<1x128xf32, #tpu.memory_space<vmem>>, vector<1x128xf32>
    %18 = vector.broadcast %17 : vector<1x128xf32> to vector<8x128xf32>
    %19 = arith.addf %16, %18 : vector<8x128xf32>
    %20 = tpu.iota {dimensions = array<i32: 1>} : vector<8x128xi32>
    %c8_i32 = arith.constant 8 : i32
    %21 = vector.broadcast %c8_i32 : i32 to vector<8x128xi32>
    %22 = arith.cmpi slt, %20, %21 : vector<8x128xi32>
    %cst_17 = arith.constant -1.000000e+30 : f32
    %23 = vector.broadcast %cst_17 : f32 to vector<8x128xf32>
    %24 = arith.select %22, %19, %23 : vector<8x128xi1>, vector<8x128xf32>
    %cst_18 = arith.constant dense<0xFF800000> : vector<8xf32>
    %25 = vector.multi_reduction <maximumf>, %24, %cst_18 [1] : vector<8x128xf32> to vector<8xf32>
    %26 = vector.shape_cast %25 : vector<8xf32> to vector<8x1xf32>
    %27 = vector.broadcast %26 : vector<8x1xf32> to vector<8x128xf32>
    %28 = arith.subf %24, %27 : vector<8x128xf32>
    %29 = math.exp %28 : vector<8x128xf32>
    %cst_19 = arith.constant dense<0.000000e+00> : vector<8xf32>
    %30 = vector.multi_reduction <add>, %29, %cst_19 [1] : vector<8x128xf32> to vector<8xf32>
    %31 = vector.shape_cast %30 : vector<8xf32> to vector<8x1xf32>
    %32 = tpu.reciprocal %31 {approx = true} : vector<8x1xf32> -> vector<8x1xf32>
    %33 = vector.broadcast %32 : vector<8x1xf32> to vector<8x128xf32>
    %34 = arith.mulf %29, %33 : vector<8x128xf32>
    %c0_20 = arith.constant 0 : index
    %c0_21 = arith.constant 0 : index
    %35 = vector.load %arg8[%c0_20, %c0_21] : memref<8x128xf32, #tpu.memory_space<vmem>>, vector<8x128xf32>
    tpu.vector_store %arg8[%c0_20, %c0_21], %34 {strides = array<i32>} : memref<8x128xf32, #tpu.memory_space<vmem>>, vector<8x128xf32>,
    %36 = tpu.iota {dimensions = array<i32: 0>} : vector<128x128xi32>
    %37 = tpu.iota {dimensions = array<i32: 1>} : vector<128x128xi32>
    %38 = arith.cmpi sle, %36, %37 : vector<128x128xi32>
    %39 = arith.extui %38 : vector<128x128xi1> to vector<128x128xi32>
    %40 = arith.sitofp %39 : vector<128x128xi32> to vector<128x128xf32>
    %cst_22 = arith.constant dense<0.000000e+00> : vector<8x128xf32>
    %41 = tpu.matmul %34, %40, %cst_22 {dimension_numbers = #tpu.dot_dimension_numbers<[1], [0], [0], [1], [0, 0, 1, 1], [], []>} : vector<8x128xf32>, vector<128x128xf32>, vector<8x128xf32> -> vector<8x128xf32>
    %c0_23 = arith.constant 0 : index
    %c0_24 = arith.constant 0 : index
    %42 = vector.load %arg7[%c0_23, %c0_24] : memref<8x1xf32, #tpu.memory_space<vmem>>, vector<8x1xf32>
    %43 = vector.broadcast %42 : vector<8x1xf32> to vector<8x128xf32>
    %44 = arith.cmpf olt, %41, %43 : vector<8x128xf32>
    %45 = arith.extui %44 : vector<8x128xi1> to vector<8x128xi32>
    %46 = arith.sitofp %45 : vector<8x128xi32> to vector<8x128xf32>
    %cst_25 = arith.constant dense<0.000000e+00> : vector<8xf32>
    %47 = vector.multi_reduction <add>, %46, %cst_25 [1] : vector<8x128xf32> to vector<8xf32>
    %48 = vector.shape_cast %47 : vector<8xf32> to vector<8x1xf32>
    %49 = arith.fptosi %48 : vector<8x1xf32> to vector<8x1xi32>
    %c7_i32 = arith.constant 7 : i32
    %50 = vector.broadcast %c7_i32 : i32 to vector<8x1xi32>
    %51 = arith.minsi %49, %50 : vector<8x1xi32>
    %c0_i32 = arith.constant 0 : i32
    %52 = vector.broadcast %c0_i32 : i32 to vector<8x128xi32>
    %53 = vector.broadcast %51 : vector<8x1xi32> to vector<8x128xi32>
    %54 = arith.addi %53, %52 : vector<8x128xi32>
    %c0_26 = arith.constant 0 : index
    %c0_27 = arith.constant 0 : index
    %55 = vector.load %arg9[%c0_26, %c0_27] : memref<8x128xi32, #tpu.memory_space<vmem>>, vector<8x128xi32>
    tpu.vector_store %arg9[%c0_26, %c0_27], %54 {strides = array<i32>} : memref<8x128xi32, #tpu.memory_space<vmem>>, vector<8x128xi32>,
    return
  }
}

</mosaic_0001>

<bundles_post_ra>
// kernel: actor_sample.1
= control target key start
LH: loop header
LB: loop body
LE: loop exit
PB: predicated region body
PF: predicated region fallthrough
CT: control target
= control target key end

     0   :  { %15 = vsyncpa [#allocation3], 0  ;;  %s538_s0 = inlined_call_operand.vmem [shape: f32[8,16], index: 0, kind: input, shape index: {}]   ;;  %s539_s1 = inlined_call_operand.vmem [shape: f32[16,128], index: 1, kind: input, shape index: {}]   ;;  %s540_s2 = inlined_call_operand.vmem [shape: f32[1,128], index: 2, kind: input, shape index: {}]   ;;  %s541_s3 = inlined_call_operand.hbm [shape: f32[128,128], index: 3, kind: input, shape index: {}]   ;;  %s542_s4 = inlined_call_operand.vmem [shape: f32[1,128], index: 4, kind: input, shape index: {}]   ;;  %s543_s5 = inlined_call_operand.hbm [shape: f32[128,128], index: 5, kind: input, shape index: {}]   ;;  %s544_s6 = inlined_call_operand.vmem [shape: f32[1,128], index: 6, kind: input, shape index: {}]   ;;  %s545_s7 = inlined_call_operand.vmem [shape: f32[8,1], index: 7, kind: input, shape index: {}]   ;;  %s546_s8 = inlined_call_operand.hbm [shape: f32[8,128], index: 8, kind: output, shape index: {0}]   ;;  %s547_s9 = inlined_call_operand.vmem [shape: s32[8,128], index: 9, kind: output, shape index: {1}]  }
   0x1   :  { %16 = vsyncpa [#allocation6], 0 }
   0x2   :  { %17 = vsyncpa [#allocation4], 0  ;;  %s28_s11 = sshll.u32 %s541_s3, 4  ;;  %s447_s12 = smov [#allocation2]   ;;  %s29_s11 = int_to_ptr.hbm [resolvable:$true] %s28_s11 }
   0x3   :  { %s30_s13 = sshll.u32 %s447_s12, 4  ;;  %s43_s16 = sshll.u32 %s543_s5, 4  ;;  %s31_s13 = int_to_ptr.vmem [resolvable:$true] %s30_s13  ;;  %s44_s16 = int_to_ptr.hbm [resolvable:$true] %s43_s16 }
   0x4   :  { %s448_s17 = smov 128   ;;  %s449_s18 = smov 8  }
   0x5   :  { %36 = dma.hbm_to_vmem [thread:$0]  %s29_s11, 2048, %s31_s13, [#allocation3], %s448_s17, %s448_s17, %s449_s18  }
   0x6   :  { %s450_s19 = smov [#allocation5]  }
   0x7   :  { %s45_s20 = sshll.u32 %s450_s19, 4  ;;  %s46_s20 = int_to_ptr.vmem [resolvable:$true] %s45_s20 }
   0x8   :  { %51 = dma.hbm_to_vmem [thread:$0]  %s44_s16, 2048, %s46_s20, [#allocation6], %s448_s17, %s448_s17, %s449_s18  }
   0x9   :  { %441 = dma.done.wait [#allocation3], 2048  }
   0xa   :  { %442 = vsyncadd [#allocation3], 4294965248 }
   0xb   :  { %443 = dma.done.wait [#allocation6], 2048  }
   0xc   :  { %444 = vsyncadd [#allocation6], 4294965248  ;;  %v66_v0 = vld [vmem:[%s539_s1 + $0x8] sm:$0xff]  ;;  %v65_v1 = vld [vmem:[%s539_s1] sm:$0xff]  ;;  %vm71_vm0 = vcmask 130048   ;;  %v177_v43 = vlaneseq  ;;  %v451_v54 = vmov 1.0  }
   0xd   :  { %89 = vmatpush.msra.mxu0 %v66_v0  ;;  %v64_v2 = vld [vmem:[%s538_s0] sm:$0xff]  ;;  %v111_v3 = vld [vmem:[#allocation2 + $0x78] sm:$0xff]  ;;  %v110_v4 = vld [vmem:[#allocation2 + $0x70] sm:$0xff]  ;;  %s453_s28 = smov [#allocation7]   ;;  %s298_s11 = sshll.u32 %s546_s8, 4  ;;  %s299_s11 = int_to_ptr.hbm [resolvable:$true] %s298_s11 }
   0xe   :  { %116 = vmatpush.msra.mxu1 %v111_v3  ;;  %v109_v5 = vld [vmem:[#allocation2 + $0x68] sm:$0xff]  ;;  %v108_v6 = vld [vmem:[#allocation2 + $0x60] sm:$0xff]  ;;  %v107_v7 = vld [vmem:[#allocation2 + $0x58] sm:$0xff]  ;;  %v178_v44 = vand.u32 127, %v177_v43  ;;  %v192_v49 = vshrl.u32 %v177_v43, 7  ;;  %s296_s29 = sshll.u32 %s453_s28, 4  ;;  %s297_s29 = int_to_ptr.vmem [resolvable:$true] %s296_s29 }
   0xf   :  { %90 = vmatpush.msra.mxu0 %v65_v1  ;;  %v106_v8 = vld [vmem:[#allocation2 + $0x50] sm:$0xff]  ;;  %v105_v9 = vld [vmem:[#allocation2 + $0x48] sm:$0xff]  ;;  %v104_v10 = vld [vmem:[#allocation2 + $0x40] sm:$0xff] }
  0x10   :  { %313 = vmatmul.msk.f32.vlgmr.msra.gmra.mxu0 %vm71_vm0, %v64_v2  ;;  %117 = vmatpush.msra.mxu1 %v110_v4  ;;  %v103_v11 = vld [vmem:[#allocation2 + $0x38] sm:$0xff]  ;;  %v102_v12 = vld [vmem:[#allocation2 + $0x30] sm:$0xff]  ;;  %v101_v13 = vld [vmem:[#allocation2 + $0x28] sm:$0xff]  ;;  %vm179_vm1 = vcmp.lt.s32.totalorder %v178_v44, 8  ;;  %v207_v50 = vadd.s32 120, %v192_v49  ;;  %v206_v51 = vadd.s32 112, %v192_v49 }
  0x11   :  { %v100_v14 = vld [vmem:[#allocation2 + $0x20] sm:$0xff]  ;;  %v99_v15 = vld [vmem:[#allocation2 + $0x18] sm:$0xff]  ;;  %v98_v16 = vld [vmem:[#allocation2 + $0x10] sm:$0xff]  ;;  %v205_v52 = vadd.s32 104, %v192_v49  ;;  %v204_v53 = vadd.s32 96, %v192_v49  ;;  %v203_v55 = vadd.s32 88, %v192_v49 }
  0x12   :  { %118 = vmatpush.msra.mxu1 %v109_v5  ;;  %v97_v17 = vld [vmem:[#allocation2 + $0x8] sm:$0xff]  ;;  %v96_v18 = vld [vmem:[#allocation2] sm:$0xff]  ;;  %v152_v19 = vld [vmem:[#allocation5 + $0x78] sm:$0xff]  ;;  %vm223_vm2 = vcmp.le.s32.totalorder %v207_v50, %v178_v44  ;;  %vm222_vm3 = vcmp.le.s32.totalorder %v206_v51, %v178_v44  ;;  %v202_v56 = vadd.s32 80, %v192_v49  ;;  %v201_v57 = vadd.s32 72, %v192_v49 }
  0x13   :  { %v151_v20 = vld [vmem:[#allocation5 + $0x70] sm:$0xff]  ;;  %157 = vmatpush.msra.mxu2 %v152_v19  ;;  %v150_v21 = vld [vmem:[#allocation5 + $0x68] sm:$0xff]  ;;  %v149_v22 = vld [vmem:[#allocation5 + $0x60] sm:$0xff]  ;;  %330 = vmatpush.msk.msra.mxu3 %vm223_vm2, %v451_v54  ;;  %vm221_vm4 = vcmp.le.s32.totalorder %v205_v52, %v178_v44  ;;  %vm220_vm5 = vcmp.le.s32.totalorder %v204_v53, %v178_v44  ;;  %vm219_vm6 = vcmp.le.s32.totalorder %v203_v55, %v178_v44  ;;  %v200_v58 = vadd.s32 64, %v192_v49 }
  0x14   :  { %119 = vmatpush.msra.mxu1 %v108_v6  ;;  %v148_v23 = vld [vmem:[#allocation5 + $0x58] sm:$0xff]  ;;  %v147_v24 = vld [vmem:[#allocation5 + $0x50] sm:$0xff]  ;;  %v146_v25 = vld [vmem:[#allocation5 + $0x48] sm:$0xff]  ;;  %vm218_vm7 = vcmp.le.s32.totalorder %v202_v56, %v178_v44  ;;  %vm217_vm8 = vcmp.le.s32.totalorder %v201_v57, %v178_v44  ;;  %v199_v59 = vadd.s32 56, %v192_v49  ;;  %v198_v60 = vadd.s32 48, %v192_v49 }
  0x15   :  { %158 = vmatpush.msra.mxu2 %v151_v20  ;;  %v145_v26 = vld [vmem:[#allocation5 + $0x40] sm:$0xff]  ;;  %v144_v27 = vld [vmem:[#allocation5 + $0x38] sm:$0xff]  ;;  %v143_v28 = vld [vmem:[#allocation5 + $0x30] sm:$0xff]  ;;  %331 = vmatpush.msk.msra.mxu3 %vm222_vm3, %v451_v54  ;;  %vm216_vm9 = vcmp.le.s32.totalorder %v200_v58, %v178_v44  ;;  %v197_v61 = vadd.s32 40, %v192_v49  ;;  %v196_v2 = vadd.s32 32, %v192_v49  ;;  %v195_v3 = vadd.s32 24, %v192_v49 }
  0x16   :  { %120 = vmatpush.msra.mxu1 %v107_v7  ;;  %v142_v29 = vld [vmem:[#allocation5 + $0x28] sm:$0xff]  ;;  %v141_v30 = vld [vmem:[#allocation5 + $0x20] sm:$0xff]  ;;  %v140_v31 = vld [vmem:[#allocation5 + $0x18] sm:$0xff]  ;;  %vm215_vm10 = vcmp.le.s32.totalorder %v199_v59, %v178_v44  ;;  %vm214_vm11 = vcmp.le.s32.totalorder %v198_v60, %v178_v44  ;;  %v194_v4 = vadd.s32 16, %v192_v49  ;;  %v193_v5 = vadd.s32 8, %v192_v49 }
  0x17   :  { %159 = vmatpush.msra.mxu2 %v150_v21  ;;  %v362_v32 = vld [vmem:[%s540_s2] ss:$0 sm:$0xff]  ;;  %v139_v36 = vld [vmem:[#allocation5 + $0x10] sm:$0xff]  ;;  %v138_v37 = vld [vmem:[#allocation5 + $0x8] sm:$0xff]  ;;  %332 = vmatpush.msk.msra.mxu3 %vm221_vm4, %v451_v54  ;;  %vm213_vm12 = vcmp.le.s32.totalorder %v197_v61, %v178_v44  ;;  %vm212_vm13 = vcmp.le.s32.totalorder %v196_v2, %v178_v44  ;;  %vm211_vm14 = vcmp.le.s32.totalorder %v195_v3, %v178_v44  ;;  %v452_v7 = vmov 0  }
  0x18   :  { %121 = vmatpush.msra.mxu1 %v106_v8  ;;  %v137_v38 = vld [vmem:[#allocation5] sm:$0xff]  ;;  %vm210_vm15 = vcmp.le.s32.totalorder %v194_v4, %v178_v44  ;;  %vm209_vm0 = vcmp.le.s32.totalorder %v193_v5, %v178_v44  ;;  %360 = vset.pattern.permute.xlu1 %v452_v7 }
  0x19   :  { %160 = vmatpush.msra.mxu2 %v149_v22  ;;  %v363_v39 = vld [vmem:[%s542_s4] ss:$0 sm:$0xff]  ;;  %333 = vmatpush.msk.msra.mxu3 %vm220_vm5, %v451_v54 }
  0x1a   :  { %122 = vmatpush.msra.mxu1 %v105_v9  ;;  %v364_v45 = vld [vmem:[%s544_s6] ss:$0 sm:$0xff]  ;;  %361 = vset.pattern.permute.xlu0 %v452_v7 }
  0x1b   :  { %161 = vmatpush.msra.mxu2 %v148_v23  ;;  %334 = vmatpush.msk.msra.mxu3 %vm219_vm6, %v451_v54  ;;  %v276_v6 = vld [vmem:[%s545_s7] sm:$0xff] }
  0x1c   :  { %123 = vmatpush.msra.mxu1 %v104_v10  ;;  %279 = vperm.xlu1 %360, %v276_v6  }
  0x1d   :  { %162 = vmatpush.msra.mxu2 %v147_v24  ;;  %335 = vmatpush.msk.msra.mxu3 %vm218_vm7, %v451_v54 }
  0x1e   :  { %124 = vmatpush.msra.mxu1 %v103_v11 }
  0x1f   :  { %163 = vmatpush.msra.mxu2 %v146_v25  ;;  %336 = vmatpush.msk.msra.mxu3 %vm217_vm8, %v451_v54 }
  0x20   :  { %125 = vmatpush.msra.mxu1 %v102_v12 }
  0x21   :  { %164 = vmatpush.msra.mxu2 %v145_v26  ;;  %337 = vmatpush.msk.msra.mxu3 %vm216_vm9, %v451_v54 }
  0x22   :  { %126 = vmatpush.msra.mxu1 %v101_v13  ;;  %v454_v13 = vmov 0.0  }
  0x23   :  { %165 = vmatpush.msra.mxu2 %v144_v27  ;;  %338 = vmatpush.msk.msra.mxu3 %vm215_vm10, %v451_v54 }
  0x24   :  { %127 = vmatpush.msra.mxu1 %v100_v14 }
  0x25   :  { %166 = vmatpush.msra.mxu2 %v143_v28  ;;  %339 = vmatpush.msk.msra.mxu3 %vm214_vm11, %v451_v54 }
  0x26   :  { %128 = vmatpush.msra.mxu1 %v99_v15 }
  0x27   :  { %167 = vmatpush.msra.mxu2 %v142_v29  ;;  %340 = vmatpush.msk.msra.mxu3 %vm213_vm12, %v451_v54 }
  0x28   :  { %129 = vmatpush.msra.mxu1 %v98_v16 }
  0x29   :  { %168 = vmatpush.msra.mxu2 %v141_v30  ;;  %341 = vmatpush.msk.msra.mxu3 %vm212_vm13, %v451_v54 }
  0x2a   :  { %130 = vmatpush.msra.mxu1 %v97_v17 }
  0x2b   :  { %169 = vmatpush.msra.mxu2 %v140_v31  ;;  %342 = vmatpush.msk.msra.mxu3 %vm211_vm14, %v451_v54 }
  0x2c   :  { %131 = vmatpush.msra.mxu1 %v96_v18 }
  0x2d   :  { %170 = vmatpush.msra.mxu2 %v139_v36  ;;  %343 = vmatpush.msk.msra.mxu3 %vm210_vm15, %v451_v54 }
  0x2f   :  { %171 = vmatpush.msra.mxu2 %v138_v37  ;;  %344 = vmatpush.msk.msra.mxu3 %vm209_vm0, %v451_v54 }
  0x31   :  { %172 = vmatpush.msra.mxu2 %v137_v38 }
  0x8d   :  { %v92_v33 = vpop.f32.mrf.mxu0 }
  0x8e   :  { %v93_v34 = vadd.f32 %v362_v32, %v92_v33  ;;  %v280_v11 = vpop.permute.xlu1 %279 }
  0x90   :  { %v95_v35 = vmax.f32 %v93_v34, 0.0 }
  0x92   :  { %132 = vmatmul.f32.vlgmr.msra.gmra.mxu1 %v95_v35 }
 0x10f   :  { %v133_v40 = vpop.f32.mrf.mxu1 }
 0x110   :  { %v134_v41 = vadd.f32 %v363_v39, %v133_v40 }
 0x112   :  { %v136_v42 = vmax.f32 %v134_v41, 0.0 }
 0x114   :  { %173 = vmatmul.f32.vlgmr.msra.gmra.mxu2 %v136_v42 }
 0x197   :  { %v174_v46 = vpop.f32.mrf.mxu2 }
 0x198   :  { %v175_v47 = vadd.f32 %v364_v45, %v174_v46 }
 0x19a   :  { %v180_v48 = vsel %vm179_vm1, %v175_v47, -1e+30  ;;  %vm208_vm1 = vcmp.le.s32.totalorder %v192_v49, %v178_v44 }
 0x19b   :  { %181 = vmax.xlane.f32.xlu0 %v180_v48  ;;  %345 = vmatpush.msk.msra.mxu3 %vm208_vm1, %v451_v54 }
 0x20e   :  { %v182_v62 = vpop.xlane.xlu0 %181 }
 0x20f   :  { %v183_v63 = vsub.f32 %v180_v48, %v182_v62 }
 0x211   :  { %v184_v0 = vmul.f32 1.442695, %v183_v63 }
 0x213   :  { %365 = vpow2.f32 %v184_v0 }
 0x219   :  { %v366_v1 = vpop.eup %365 }
 0x21a   :  { %186 = vadd.xlane.f32.xlu0 %v366_v1 }
 0x28d   :  { %v187_v8 = vpop.xlane.xlu0 %186 }
 0x28e   :  { %367 = vrcp.f32 %v187_v8 }
 0x294   :  { %v368_v9 = vpop.eup %367 }
 0x295   :  { %v189_v10 = vmul.f32 %v368_v9, %v366_v1 }
 0x297   :  { %272 = vmatmul.f32.vlgmr.msra.gmra.mxu3 %v189_v10  ;;  %190 = vst [vmem:[#allocation7] sm:$0xff] %v189_v10 }
 0x298   :  { %301 = dma.vmem_to_hbm [thread:$0]  %s297_s29, 128, %s299_s11, [#allocation4]  }
 0x31a   :  { %v273_v12 = vpop.f32.mrf.mxu3 }
 0x31b   :  { %vm282_vm2 = vcmp.lt.f32.partialorder %v273_v12, %v280_v11 }
 0x31c   :  { %v346_v14 = vsel %vm282_vm2, 1.0, %v454_v13 }
 0x31d   :  { %285 = vadd.xlane.f32.xlu1 %v346_v14 }
 0x390   :  { %v286_v15 = vpop.xlane.xlu1 %285 }
 0x391   :  { %vm347_vm3 = vcmp.lt.s32.totalorder %v286_v15, 0  ;;  %v348_v16 = vceil.f32 %v286_v15  ;;  %v349_v17 = vfloor.f32 %v286_v15 }
 0x393   :  { %v350_v18 = vsel %vm347_vm3, %v348_v16, %v349_v17 }
 0x394   :  { %v351_v19 = vcvt.f32.s32 %v350_v18 }
 0x396   :  { %vm288_vm4 = vcmp.lt.s32.totalorder %v351_v19, 7 }
 0x397   :  { %v289_v20 = vsel %vm288_vm4, %v351_v19, 7 }
 0x398   :  { %290 = vst [vmem:[%s547_s9] sm:$0xff] %v289_v20 }
 0x399   :  { %445 = dma.done.wait [#allocation4], 128  }
 0x39a   :  { %446 = vsyncadd [#allocation4], 4294967168 }
 0x39b   :  { %310 = vsyncpa [#allocation3], 1 }
 0x39c   :  { %311 = vsyncpa [#allocation6], 1 }
 0x39d   :  { %312 = vsyncpa [#allocation4], 1 }

</bundles_post_ra>
